<compile_context>
chip_gen: v7x
topology: tpu7x:2x2x1
jax: 0.10.0
libtpu: 0.0.40
codegen_flags: <defaults>
</compile_context>

<pallas_src>
import functools

import jax
import jax.numpy as jnp
from jax.experimental import pallas as pl
from jax.experimental.pallas import tpu as pltpu


# ---------------------------------------------------------------------------
# Kernel
# ---------------------------------------------------------------------------
def decoder_mlp_kernel(alpha_ref,            # SMEM: (2,) PReLU alphas (f32)
                       x_ref,                # VMEM: (TB, latent)   compute dtype
                       w1_ref, b1_ref,       # (latent, u3) compute dtype, (1, u3) f32
                       w2_ref, b2_ref,       # (u3, u2)     compute dtype, (1, u2) f32
                       w3_ref, b3_ref,       # (u2, u1)     compute dtype, (1, u1) f32
                       o_ref):               # VMEM: (TB, u1) f32
    # Pull the scalar alphas off SMEM once, before any MXU work.
    a0 = alpha_ref[0]
    a1 = alpha_ref[1]

    compute_dtype = w1_ref.dtype
    x = x_ref[...]

    # Layer 1: Linear + PReLU   (accumulate in f32, elementwise in f32)
    h1 = jnp.dot(x, w1_ref[...], preferred_element_type=jnp.float32) + b1_ref[...]
    h1 = jnp.where(h1 > 0, h1, a0 * h1).astype(compute_dtype)

    # Layer 2: Linear + PReLU
    h2 = jnp.dot(h1, w2_ref[...], preferred_element_type=jnp.float32) + b2_ref[...]
    h2 = jnp.where(h2 > 0, h2, a1 * h2).astype(compute_dtype)

    # Layer 3: Linear (lane-dense 128-wide f32 store)
    o_ref[...] = (jnp.dot(h2, w3_ref[...], preferred_element_type=jnp.float32)
                  + b3_ref[...]).astype(o_ref.dtype)


# ---------------------------------------------------------------------------
# Wrapper
# ---------------------------------------------------------------------------
def _round_up(x, m):
    return ((x + m - 1) // m) * m


def decoder_net_forward(x, params, *, tb=1024):
    """Fused forward pass of DecoderNet.

    x:      (B, units_latent_layer) float32
    params: dict with w1,b1,w2,b2,w3,b3,alphas (weights may be f32 or bf16)
    tb:     batch tile size (sweepable; clamped to the padded batch).
    """
    compute_dtype = params["w1"].dtype
    latent = params["w1"].shape[0]
    u3 = params["w1"].shape[1]
    u2 = params["w2"].shape[1]
    u1 = params["w3"].shape[1]

    B = x.shape[0]
    # Tile must be a multiple of 8 (sublanes); pad batch so the grid divides evenly.
    tb = max(8, min(tb, _round_up(B, 8)))
    b_pad = _round_up(B, tb)
    if b_pad != B:
        x = jnp.pad(x, ((0, b_pad - B), (0, 0)))
    x = x.astype(compute_dtype)

    grid = (pl.cdiv(b_pad, tb),)

    # --- VMEM budget (double-buffered x/out tiles + resident weights + intermediates)
    act_bytes = jnp.dtype(compute_dtype).itemsize
    weight_bytes = (latent * u3 + u3 * u2 + u2 * u1) * act_bytes \
                   + (u3 + u2 + u1) * 4
    io_bytes = 2 * (tb * latent * act_bytes + tb * u1 * 4)      # 2x double-buffered
    inter_bytes = tb * (u3 + u2) * 4                            # h1/h2 f32 temporaries
    vmem_limit = min(64 << 20, max(2 * (weight_bytes + io_bytes + inter_bytes),
                                   4 << 20))

    smem = pl.BlockSpec(memory_space=pltpu.SMEM)
    const2d = lambda i: (0, 0)   # weights/biases: same block every grid step -> resident

    out = pl.pallas_call(
        decoder_mlp_kernel,
        out_shape=jax.ShapeDtypeStruct((b_pad, u1), jnp.float32),
        grid=grid,
        in_specs=[
            smem,                                                # alphas
            pl.BlockSpec((tb, latent), lambda i: (i, 0)),        # x tile
            pl.BlockSpec((latent, u3), const2d),                 # w1
            pl.BlockSpec((1, u3), const2d),                      # b1
            pl.BlockSpec((u3, u2), const2d),                     # w2
            pl.BlockSpec((1, u2), const2d),                      # b2
            pl.BlockSpec((u2, u1), const2d),                     # w3
            pl.BlockSpec((1, u1), const2d),                      # b3
        ],
        out_specs=pl.BlockSpec((tb, u1), lambda i: (i, 0)),
        compiler_params=pltpu.CompilerParams(
            dimension_semantics=("parallel",),                   # megacore on v7x
            vmem_limit_bytes=int(vmem_limit),
        ),
    )(params["alphas"], x,
      params["w1"], params["b1"],
      params["w2"], params["b2"],
      params["w3"], params["b3"])

    return out[:B]


# ---------------------------------------------------------------------------
# Params / reference
# ---------------------------------------------------------------------------
def init_params(key, nn_config, weight_dtype=jnp.float32):
    """Deterministic init mirroring PyTorch defaults (U(-1/sqrt(fan_in), +1/sqrt(fan_in)))."""
    latent = nn_config["units_latent_layer"]
    u3 = nn_config["units_3rd_layer"]
    u2 = nn_config["units_2nd_layer"]
    u1 = nn_config["units_1st_layer"]

    ks = jax.random.split(key, 6)

    def linear(kw, kb, fan_in, fan_out):
        bound = 1.0 / jnp.sqrt(fan_in)
        w = jax.random.uniform(kw, (fan_in, fan_out), jnp.float32, -bound, bound)
        b = jax.random.uniform(kb, (1, fan_out), jnp.float32, -bound, bound)
        return w.astype(weight_dtype), b  # biases stay f32 (added post-accumulation)

    w1, b1 = linear(ks[0], ks[1], latent, u3)
    w2, b2 = linear(ks[2], ks[3], u3, u2)
    w3, b3 = linear(ks[4], ks[5], u2, u1)
    alphas = jnp.array([0.25, 0.25], dtype=jnp.float32)  # nn.PReLU() default init

    return dict(w1=w1, b1=b1, w2=w2, b2=b2, w3=w3, b3=b3, alphas=alphas)


def reference_forward(x, p):
    w1 = p["w1"].astype(jnp.float32)
    w2 = p["w2"].astype(jnp.float32)
    w3 = p["w3"].astype(jnp.float32)
    h1 = x @ w1 + p["b1"]
    h1 = jnp.where(h1 > 0, h1, p["alphas"][0] * h1)
    h2 = h1 @ w2 + p["b2"]
    h2 = jnp.where(h2 > 0, h2, p["alphas"][1] * h2)
    return h2 @ w3 + p["b3"]


# ---------------------------------------------------------------------------
# Self-test
# ---------------------------------------------------------------------------
if __name__ == "__main__":
    nn_config = {
        "units_latent_layer": 16,
        "units_3rd_layer": 32,
        "units_2nd_layer": 64,
        "units_1st_layer": 128,
    }
    key = jax.random.PRNGKey(0)
    k_x, k_p = jax.random.split(key)

    # --- small-batch f32 check (single grid step) ---------------------------
    B = 8
    x = jax.random.normal(k_x, (B, nn_config["units_latent_layer"]), jnp.float32)
    params = init_params(k_p, nn_config, weight_dtype=jnp.float32)

    out = jax.block_until_ready(decoder_net_forward(x, params))
    ref = reference_forward(x, params)
    assert out.shape == (B, nn_config["units_1st_layer"])
    assert jnp.allclose(out, ref, atol=1e-4, rtol=1e-4), "f32 mismatch"

    # --- ragged batch, multi-step grid (exercises padding + pipelining) -----
    B2 = 20
    x2 = jax.random.normal(k_x, (B2, nn_config["units_latent_layer"]), jnp.float32)
    out2 = jax.block_until_ready(decoder_net_forward(x2, params, tb=8))
    ref2 = reference_forward(x2, params)
    assert out2.shape == (B2, nn_config["units_1st_layer"])
    assert jnp.allclose(out2, ref2, atol=1e-4, rtol=1e-4), "gridded f32 mismatch"

    # --- bf16 weights/activations path (v6e/v7x MXU-friendly) ---------------
    params_bf16 = init_params(k_p, nn_config, weight_dtype=jnp.bfloat16)
    out_bf16 = jax.block_until_ready(decoder_net_forward(x, params_bf16))
    ref_bf16 = reference_forward(x, params_bf16)
    assert jnp.allclose(out_bf16, ref_bf16, atol=5e-2, rtol=5e-2), "bf16 mismatch"

    print("KERNEL_OK")
</pallas_src>

<mosaic_0001>
module attributes {stable_mosaic.version = 11 : i64} {
  func.func @decoder_mlp_kernel(%arg0: i32, %arg1: memref<2xf32, #tpu.memory_space<smem>>, %arg2: memref<8x16xf32, #tpu.memory_space<vmem>>, %arg3: memref<16x32xf32, #tpu.memory_space<vmem>>, %arg4: memref<1x32xf32, #tpu.memory_space<vmem>>, %arg5: memref<32x64xf32, #tpu.memory_space<vmem>>, %arg6: memref<1x64xf32, #tpu.memory_space<vmem>>, %arg7: memref<64x128xf32, #tpu.memory_space<vmem>>, %arg8: memref<1x128xf32, #tpu.memory_space<vmem>>, %arg9: memref<8x128xf32, #tpu.memory_space<vmem>>) attributes {dimension_semantics = [#tpu.dimension_semantics<parallel>], iteration_bounds = array<i64: 1>, scalar_prefetch = 0 : i64, scratch_operands = 0 : i64, tpu.core_type = #tpu.core_type<tc>, window_params = [{transform_indices = @transform_0, window_bounds = array<i64: 2>}, {transform_indices = @transform_1, window_bounds = array<i64: 8, 16>}, {pipeline_mode = #tpu.pipeline_mode<synchronous>, transform_indices = @transform_2, window_bounds = array<i64: 16, 32>}, {pipeline_mode = #tpu.pipeline_mode<synchronous>, transform_indices = @transform_3, window_bounds = array<i64: 1, 32>}, {pipeline_mode = #tpu.pipeline_mode<synchronous>, transform_indices = @transform_4, window_bounds = array<i64: 32, 64>}, {pipeline_mode = #tpu.pipeline_mode<synchronous>, transform_indices = @transform_5, window_bounds = array<i64: 1, 64>}, {pipeline_mode = #tpu.pipeline_mode<synchronous>, transform_indices = @transform_6, window_bounds = array<i64: 64, 128>}, {pipeline_mode = #tpu.pipeline_mode<synchronous>, transform_indices = @transform_7, window_bounds = array<i64: 1, 128>}, {transform_indices = @transform_8, window_bounds = array<i64: 8, 128>}]} {
    %c0 = arith.constant 0 : index
    %0 = memref.load %arg1[%c0] : memref<2xf32, #tpu.memory_space<smem>>
    %c1 = arith.constant 1 : index
    %1 = memref.load %arg1[%c1] : memref<2xf32, #tpu.memory_space<smem>>
    %c0_0 = arith.constant 0 : index
    %c0_1 = arith.constant 0 : index
    %2 = vector.load %arg2[%c0_0, %c0_1] : memref<8x16xf32, #tpu.memory_space<vmem>>, vector<8x16xf32>
    %c0_2 = arith.constant 0 : index
    %c0_3 = arith.constant 0 : index
    %3 = vector.load %arg3[%c0_2, %c0_3] : memref<16x32xf32, #tpu.memory_space<vmem>>, vector<16x32xf32>
    %cst = arith.constant dense<0.000000e+00> : vector<8x32xf32>
    %4 = tpu.matmul %2, %3, %cst {dimension_numbers = #tpu.dot_dimension_numbers<[1], [0], [0], [1], [0, 0, 1, 1], [], []>} : vector<8x16xf32>, vector<16x32xf32>, vector<8x32xf32> -> vector<8x32xf32>
    %c0_4 = arith.constant 0 : index
    %c0_5 = arith.constant 0 : index
    %5 = vector.load %arg4[%c0_4, %c0_5] : memref<1x32xf32, #tpu.memory_space<vmem>>, vector<1x32xf32>
    %6 = vector.broadcast %5 : vector<1x32xf32> to vector<8x32xf32>
    %7 = arith.addf %4, %6 : vector<8x32xf32>
    %cst_6 = arith.constant 0.000000e+00 : f32
    %8 = vector.broadcast %cst_6 : f32 to vector<8x32xf32>
    %9 = arith.cmpf ogt, %7, %8 : vector<8x32xf32>
    %10 = vector.broadcast %0 : f32 to vector<8x32xf32>
    %11 = arith.mulf %10, %7 : vector<8x32xf32>
    %12 = arith.select %9, %7, %11 : vector<8x32xi1>, vector<8x32xf32>
    %c0_7 = arith.constant 0 : index
    %c0_8 = arith.constant 0 : index
    %13 = vector.load %arg5[%c0_7, %c0_8] : memref<32x64xf32, #tpu.memory_space<vmem>>, vector<32x64xf32>
    %cst_9 = arith.constant dense<0.000000e+00> : vector<8x64xf32>
    %14 = tpu.matmul %12, %13, %cst_9 {dimension_numbers = #tpu.dot_dimension_numbers<[1], [0], [0], [1], [0, 0, 1, 1], [], []>} : vector<8x32xf32>, vector<32x64xf32>, vector<8x64xf32> -> vector<8x64xf32>
    %c0_10 = arith.constant 0 : index
    %c0_11 = arith.constant 0 : index
    %15 = vector.load %arg6[%c0_10, %c0_11] : memref<1x64xf32, #tpu.memory_space<vmem>>, vector<1x64xf32>
    %16 = vector.broadcast %15 : vector<1x64xf32> to vector<8x64xf32>
    %17 = arith.addf %14, %16 : vector<8x64xf32>
    %cst_12 = arith.constant 0.000000e+00 : f32
    %18 = vector.broadcast %cst_12 : f32 to vector<8x64xf32>
    %19 = arith.cmpf ogt, %17, %18 : vector<8x64xf32>
    %20 = vector.broadcast %1 : f32 to vector<8x64xf32>
    %21 = arith.mulf %20, %17 : vector<8x64xf32>
    %22 = arith.select %19, %17, %21 : vector<8x64xi1>, vector<8x64xf32>
    %c0_13 = arith.constant 0 : index
    %c0_14 = arith.constant 0 : index
    %23 = vector.load %arg7[%c0_13, %c0_14] : memref<64x128xf32, #tpu.memory_space<vmem>>, vector<64x128xf32>
    %cst_15 = arith.constant dense<0.000000e+00> : vector<8x128xf32>
    %24 = tpu.matmul %22, %23, %cst_15 {dimension_numbers = #tpu.dot_dimension_numbers<[1], [0], [0], [1], [0, 0, 1, 1], [], []>} : vector<8x64xf32>, vector<64x128xf32>, vector<8x128xf32> -> vector<8x128xf32>
    %c0_16 = arith.constant 0 : index
    %c0_17 = arith.constant 0 : index
    %25 = vector.load %arg8[%c0_16, %c0_17] : memref<1x128xf32, #tpu.memory_space<vmem>>, vector<1x128xf32>
    %26 = vector.broadcast %25 : vector<1x128xf32> to vector<8x128xf32>
    %27 = arith.addf %24, %26 : vector<8x128xf32>
    %c0_18 = arith.constant 0 : index
    %c0_19 = arith.constant 0 : index
    %28 = vector.load %arg9[%c0_18, %c0_19] : memref<8x128xf32, #tpu.memory_space<vmem>>, vector<8x128xf32>
    tpu.vector_store %arg9[%c0_18, %c0_19], %27 {strides = array<i32>} : memref<8x128xf32, #tpu.memory_space<vmem>>, vector<8x128xf32>,
    return
  }
  func.func @transform_0(%arg0: i32) -> i32 {
    %c0_i32 = arith.constant 0 : i32
    %c0_i32_0 = arith.constant 0 : i32
    return %c0_i32 : i32
  }
  func.func @transform_1(%arg0: i32) -> (i32, i32) {
    %c0_i32 = arith.constant 0 : i32
    %c0_i32_0 = arith.constant 0 : i32
    return %arg0, %c0_i32 : i32, i32
  }
  func.func @transform_2(%arg0: i32) -> (i32, i32) {
    %c0_i32 = arith.constant 0 : i32
    %c0_i32_0 = arith.constant 0 : i32
    %c0_i32_1 = arith.constant 0 : i32
    return %c0_i32, %c0_i32_0 : i32, i32
  }
  func.func @transform_3(%arg0: i32) -> (i32, i32) {
    %c0_i32 = arith.constant 0 : i32
    %c0_i32_0 = arith.constant 0 : i32
    %c0_i32_1 = arith.constant 0 : i32
    return %c0_i32, %c0_i32_0 : i32, i32
  }
  func.func @transform_4(%arg0: i32) -> (i32, i32) {
    %c0_i32 = arith.constant 0 : i32
    %c0_i32_0 = arith.constant 0 : i32
    %c0_i32_1 = arith.constant 0 : i32
    return %c0_i32, %c0_i32_0 : i32, i32
  }
  func.func @transform_5(%arg0: i32) -> (i32, i32) {
    %c0_i32 = arith.constant 0 : i32
    %c0_i32_0 = arith.constant 0 : i32
    %c0_i32_1 = arith.constant 0 : i32
    return %c0_i32, %c0_i32_0 : i32, i32
  }
  func.func @transform_6(%arg0: i32) -> (i32, i32) {
    %c0_i32 = arith.constant 0 : i32
    %c0_i32_0 = arith.constant 0 : i32
    %c0_i32_1 = arith.constant 0 : i32
    return %c0_i32, %c0_i32_0 : i32, i32
  }
  func.func @transform_7(%arg0: i32) -> (i32, i32) {
    %c0_i32 = arith.constant 0 : i32
    %c0_i32_0 = arith.constant 0 : i32
    %c0_i32_1 = arith.constant 0 : i32
    return %c0_i32, %c0_i32_0 : i32, i32
  }
  func.func @transform_8(%arg0: i32) -> (i32, i32) {
    %c0_i32 = arith.constant 0 : i32
    %c0_i32_0 = arith.constant 0 : i32
    return %arg0, %c0_i32 : i32, i32
  }
}

</mosaic_0001>

<bundles_post_ra>
// kernel: tpu_custom_call.1
= control target key start
LH: loop header
LB: loop body
LE: loop exit
PB: predicated region body
PF: predicated region fallthrough
CT: control target
= control target key end

     0   :  { %13 = vsyncpa [#allocation5], 0  ;;  %s757_s0 = inlined_call_operand.hbm [shape: f32[2], index: 0, kind: input, shape index: {}]   ;;  %s758_s1 = inlined_call_operand.hbm [shape: f32[8,16], index: 1, kind: input, shape index: {}]   ;;  %s759_s2 = inlined_call_operand.hbm [shape: f32[16,32], index: 2, kind: input, shape index: {}]   ;;  %s760_s3 = inlined_call_operand.vmem [shape: f32[1,32], index: 3, kind: input, shape index: {}]   ;;  %s761_s4 = inlined_call_operand.hbm [shape: f32[32,64], index: 4, kind: input, shape index: {}]   ;;  %s762_s5 = inlined_call_operand.vmem [shape: f32[1,64], index: 5, kind: input, shape index: {}]   ;;  %s763_s6 = inlined_call_operand.hbm [shape: f32[64,128], index: 6, kind: input, shape index: {}]   ;;  %s764_s7 = inlined_call_operand.vmem [shape: f32[1,128], index: 7, kind: input, shape index: {}]   ;;  %s765_s8 = inlined_call_operand.hbm [shape: f32[8,128], index: 8, kind: output, shape index: {}]  }
   0x1   :  { %14 = vsyncpa [#allocation3], 0 }
   0x2   :  { %15 = vsyncpa [#allocation8], 0 }
   0x3   :  { %16 = vsyncpa [#allocation11], 0 }
   0x4   :  { %17 = vsyncpa [#allocation4], 0  ;;  %s604_s27 = smov [#allocation7]   ;;  %s474_s9 = scalar_lea.hbm %s759_s2, 256 }
   0x5   :  { %s41_s28 = sshll.u32 %s604_s27, 4  ;;  %p475_p0 = scmp.ne.s32.totalorder %s759_s2, %s474_s9  ;;  %s42_s28 = int_to_ptr.vmem [resolvable:$true] %s41_s28 }
   0x6   :  { %p478_p1 = scmp.lt.u32.totalorder %s474_s9, %s759_s2 }
   0x8   :  { %p480_p2 = pnand %p478_p1, %p475_p0 }
   0xa   :  { %483 = shalt.err (!%p480_p2)
}
   0xb   :  { %s484_s14 = scalar_lea.vmem %s42_s28, 256  ;;  %p489_p4 = scmp.lt.s32.totalorder %s42_s28, %s42_s28 }
   0xc   :  { %p485_p3 = scmp.ne.s32.totalorder %s42_s28, %s484_s14  ;;  %p490_p5 = scmp.lt.s32.totalorder %s484_s14, %s484_s14 }
   0xe   :  { %p491_p6 = por %p490_p5, %p489_p4 }
  0x10   :  { %p492_p7 = pnand %p491_p6, %p485_p3 }
  0x12   :  { %495 = shalt.err (!%p492_p7)
}
  0x13   :  { %s605_s15 = smov 128   ;;  %s606_s16 = smov 8  }
  0x14   :  { %47 = dma.hbm_to_vmem [thread:$0]  %s759_s2, 256, %s42_s28, [#allocation8], %s605_s15, %s605_s15, %s606_s16  }
  0x15   :  { %s496_s21 = scalar_lea.hbm %s757_s0, 16 }
  0x16   :  { %p497_p8 = scmp.ne.s32.totalorder %s757_s0, %s496_s21  ;;  %p500_p9 = scmp.lt.u32.totalorder %s496_s21, %s757_s0 }
  0x18   :  { %p502_p10 = pnand %p500_p9, %p497_p8 }
  0x1a   :  { %505 = shalt.err (!%p502_p10)
}
  0x1b   :  { %s607_s26 = smov [#allocation2]   ;;  %s608_s2 = smov [#allocation6]  }
  0x1c   :  { %25 = dma.hbm_to_smem %s757_s0, 16, %s607_s26, [#allocation5]  }
  0x1d   :  { %s32_s28 = sshll.u32 %s608_s2, 4  ;;  %s609_s30 = smov [#allocation9]   ;;  %s33_s28 = int_to_ptr.vmem [resolvable:$true] %s32_s28 }
  0x1e   :  { %s55_s9 = sshll.u32 %s609_s30, 4  ;;  %s506_s12 = scalar_lea.hbm %s758_s1, 128  ;;  %s687_s9 = int_to_ptr.vmem [resolvable:$true] %s55_s9 }
  0x1f   :  { %p507_p11 = scmp.ne.s32.totalorder %s758_s1, %s506_s12  ;;  %p510_p12 = scmp.lt.u32.totalorder %s506_s12, %s758_s1 }
  0x21   :  { %p512_p13 = pnand %p510_p12, %p507_p11 }
  0x23   :  { %515 = shalt.err (!%p512_p13)
}
  0x24   :  { %s516_s0 = scalar_lea.vmem %s33_s28, 128  ;;  %p521_p1 = scmp.lt.s32.totalorder %s33_s28, %s33_s28 }
  0x25   :  { %p517_p0 = scmp.ne.s32.totalorder %s33_s28, %s516_s0  ;;  %p522_p2 = scmp.lt.s32.totalorder %s516_s0, %s516_s0 }
  0x27   :  { %p523_p3 = por %p522_p2, %p521_p1 }
  0x29   :  { %p524_p4 = pnand %p523_p3, %p517_p0 }
  0x2b   :  { %527 = shalt.err (!%p524_p4)
}
  0x2c   :  { %35 = dma.hbm_to_vmem [thread:$0]  %s758_s1, 128, %s33_s28, [#allocation3]  }
  0x2d   :  { %s528_s23 = scalar_lea.hbm %s761_s4, 512 }
  0x2e   :  { %p529_p5 = scmp.ne.s32.totalorder %s761_s4, %s528_s23  ;;  %p532_p6 = scmp.lt.u32.totalorder %s528_s23, %s761_s4 }
  0x30   :  { %p534_p7 = pnand %p532_p6, %p529_p5 }
  0x32   :  { %537 = shalt.err (!%p534_p7)
}
  0x33   :  { %s538_s29 = scalar_lea.vmem %s687_s9, 512  ;;  %p543_p9 = scmp.lt.s32.totalorder %s687_s9, %s687_s9 }
  0x34   :  { %p539_p8 = scmp.ne.s32.totalorder %s687_s9, %s538_s29  ;;  %p544_p10 = scmp.lt.s32.totalorder %s538_s29, %s538_s29 }
  0x36   :  { %p545_p11 = por %p544_p10, %p543_p9 }
  0x38   :  { %p546_p12 = pnand %p545_p11, %p539_p8 }
  0x3a   :  { %549 = shalt.err (!%p546_p12)
}
  0x3b   :  { %61 = dma.hbm_to_vmem [thread:$0]  %s761_s4, 512, %s687_s9, [#allocation8], %s605_s15, %s605_s15, %s606_s16  }
  0x3c   :  { %s610_s28 = smov [#allocation10]   ;;  %s550_s12 = scalar_lea.hbm %s763_s6, 1024 }
  0x3d   :  { %s69_s30 = sshll.u32 %s610_s28, 4  ;;  %p551_p13 = scmp.ne.s32.totalorder %s763_s6, %s550_s12  ;;  %s70_s30 = int_to_ptr.vmem [resolvable:$true] %s69_s30 }
  0x3e   :  { %p554_p0 = scmp.lt.u32.totalorder %s550_s12, %s763_s6 }
  0x40   :  { %p556_p1 = pnand %p554_p0, %p551_p13 }
  0x42   :  { %559 = shalt.err (!%p556_p1)
}
  0x43   :  { %s560_s0 = scalar_lea.vmem %s70_s30, 1024  ;;  %p565_p3 = scmp.lt.s32.totalorder %s70_s30, %s70_s30 }
  0x44   :  { %p561_p2 = scmp.ne.s32.totalorder %s70_s30, %s560_s0  ;;  %p566_p4 = scmp.lt.s32.totalorder %s560_s0, %s560_s0 }
  0x46   :  { %p567_p5 = por %p566_p4, %p565_p3 }
  0x48   :  { %p568_p6 = pnand %p567_p5, %p561_p2 }
  0x4a   :  { %571 = shalt.err (!%p568_p6)
}
  0x4b   :  { %75 = dma.hbm_to_vmem [thread:$0]  %s763_s6, 1024, %s70_s30, [#allocation11], %s605_s15, %s605_s15, %s606_s16  }
  0x4c   :  { %594 = dma.done.wait [#allocation5], 16  }
  0x4d   :  { %595 = vsyncadd [#allocation5], 4294967280 }
  0x4e   :  { %596 = dma.done.wait [#allocation3], 128  }
  0x4f   :  { %597 = vsyncadd [#allocation3], 4294967168 }
  0x50   :  { %598 = dma.done.wait [#allocation8], 768  }
  0x51   :  { %599 = vsyncadd [#allocation8], 4294966528 }
  0x52   :  { %600 = dma.done.wait [#allocation11], 1024  }
  0x53   :  { %601 = vsyncadd [#allocation11], 4294966272 }
  0x54   :  { %93 = sfence }
  0x55   :  { %v97_v0 = vld [vmem:[#allocation7] sm:$0xff]  ;;  %v98_v1 = vld [vmem:[#allocation7 + $0x8] sm:$0xff]  ;;  %v611_v2 = vmov 0.0|0.0   ;;  %vm612_vm0 = vmmov 0   ;;  %v613_v4 = vmov 0.0   ;;  %v184_v5 = vld [vmem:[#allocation9] sm:$0xff] }
  0x56   :  { %442 = vmatprep.subr.bf16.mxu1 %v611_v2  ;;  %v443_v3 = vpack.c.bf16 %v98_v1, %v97_v0  ;;  %409 = vmatprep.mubr.msk.f32.mxu1 %vm612_vm0, %v613_v4  ;;  %v185_v6 = vld [vmem:[#allocation9 + $0x8] sm:$0xff]  ;;  %vm106_vm1 = vcmask 130048   ;;  %v186_v9 = vld [vmem:[#allocation9 + $0x10] sm:$0xff]  ;;  %v187_v10 = vld [vmem:[#allocation9 + $0x18] sm:$0xff]  ;;  %s94_s6 = sld [smem:[#allocation2]]  ;;  %vm195_vm3 = vcmask 261120  }
  0x57   :  { %451 = vmatprep.subr.bf16.mxu0 %v611_v2  ;;  %439 = vmatprep.mubr.msk.f32.mxu0 %vm612_vm0, %v613_v4  ;;  %v96_v7 = vld [vmem:[#allocation6] sm:$0xff]  ;;  %v446_v8 = vpack.c.bf16 %v185_v6, %v184_v5  ;;  %v449_v11 = vpack.c.bf16 %v187_v10, %v186_v9  ;;  %v273_v12 = vld [vmem:[#allocation10] sm:$0xff]  ;;  %v275_v14 = vld [vmem:[#allocation10 + $0x10] sm:$0xff]  ;;  %s381_s19 = sld [smem:[#allocation2 + $0x1]]  ;;  %vm288_vm5 = vcmask 523264   ;;  %s614_s23 = smov [#allocation12]  }
  0x58   :  { %444 = vmatpush3.bf16.msra.mxu1 %v443_v3  ;;  %v274_v13 = vld [vmem:[#allocation10 + $0x8] sm:$0xff]  ;;  %v276_v16 = vld [vmem:[#allocation10 + $0x18] sm:$0xff]  ;;  %v277_v18 = vld [vmem:[#allocation10 + $0x20] sm:$0xff]  ;;  %s369_s24 = sshll.u32 %s614_s23, 4  ;;  %s370_s24 = int_to_ptr.vmem [resolvable:$true] %s369_s24 }
  0x59   :  { %445 = vmatprep.subr.bf16.mxu1 %v611_v2  ;;  %v452_v15 = vpack.c.bf16 %v274_v13, %v273_v12  ;;  %v455_v17 = vpack.c.bf16 %v276_v16, %v275_v14  ;;  %v278_v19 = vld [vmem:[#allocation10 + $0x28] sm:$0xff]  ;;  %v279_v28 = vld [vmem:[#allocation10 + $0x30] sm:$0xff]  ;;  %v280_v29 = vld [vmem:[#allocation10 + $0x38] sm:$0xff]  ;;  %p577_p8 = scmp.lt.s32.totalorder %s370_s24, %s370_s24 }
  0x5a   :  { %v458_v20 = vpack.c.bf16 %v278_v19, %v277_v18  ;;  %v382_v21 = vld [vmem:[%s760_s3] ss:$0 sm:$0xff]  ;;  %v461_v30 = vpack.c.bf16 %v280_v29, %v279_v28 }
  0x5b   :  { %410 = vmatmul.mubr.msk.f32.vlgmr.msra.gmra.mrb[0].mxu1 %vm106_vm1, %v96_v7  ;;  %453 = vmatpush3.bf16.msra.mxu0 %v452_v15  ;;  %v384_v31 = vld [vmem:[%s762_s5] ss:$0 sm:$0xff]  ;;  %s572_s5 = scalar_lea.vmem %s370_s24, 128 }
  0x5c   :  { %447 = vmatpush3.bf16.msra.mxu1 %v446_v8  ;;  %420 = vmatprep.mubr.msk.f32.mxu1 %vm612_vm0, %v613_v4  ;;  %v181_v23 = vstv %s94_s6  ;;  %v386_v38 = vld [vmem:[%s764_s7] ss:$0 sm:$0xff]  ;;  %p573_p7 = scmp.ne.s32.totalorder %s370_s24, %s572_s5  ;;  %p578_p9 = scmp.lt.s32.totalorder %s572_s5, %s572_s5 }
  0x5d   :  { %448 = vmatprep.subr.bf16.mxu1 %v611_v2  ;;  %454 = vmatprep.subr.bf16.mxu0 %v611_v2  ;;  %v270_v33 = vstv %s381_s19 }
  0x5e   :  { %p579_p10 = por %p578_p9, %p577_p8 }
  0x5f   :  { %456 = vmatpush3.bf16.msra.mxu0 %v455_v17 }
  0x60   :  { %450 = vmatpush3.bf16.msra.mxu1 %v449_v11  ;;  %457 = vmatprep.subr.bf16.mxu0 %v611_v2  ;;  %p580_p11 = pnand %p579_p10, %p573_p7 }
  0x63   :  { %459 = vmatpush3.bf16.msra.mxu0 %v458_v20 }
  0x64   :  { %460 = vmatprep.subr.bf16.mxu0 %v611_v2 }
  0x67   :  { %462 = vmatpush3.bf16.msra.mxu0 %v461_v30 }
 0x12e   :  { %v176_v22 = vpop.f32.mrb[0].mxu1 }
 0x12f   :  { %v177_v24 = vadd.f32 %v382_v21, %v176_v22  ;;  %v411_v25 = vpop.f32.mrb[1].mxu1 }
 0x131   :  { %vm180_vm2 = vcmp.gt.f32.partialorder %v177_v24, 0.0  ;;  %v182_v26 = vmul.f32 %v181_v23, %v177_v24 }
 0x133   :  { %v183_v27 = vsel %vm180_vm2, %v177_v24, %v182_v26 }
 0x134   :  { %421 = vmatmul.mubr.msk.f32.vlgmr.msra.gmra.mrb[2].mxu1 %vm195_vm3, %v183_v27 }
 0x207   :  { %v265_v32 = vpop.f32.mrb[2].mxu1 }
 0x208   :  { %v266_v34 = vadd.f32 %v384_v31, %v265_v32  ;;  %v422_v35 = vpop.f32.mrb[3].mxu1 }
 0x20a   :  { %vm269_vm4 = vcmp.gt.f32.partialorder %v266_v34, 0.0  ;;  %v271_v36 = vmul.f32 %v270_v33, %v266_v34 }
 0x20c   :  { %v272_v37 = vsel %vm269_vm4, %v266_v34, %v271_v36 }
 0x20d   :  { %440 = vmatmul.mubr.msk.f32.vlgmr.msra.gmra.mrb[0].mxu0 %vm288_vm5, %v272_v37 }
 0x2e0   :  { %v358_v39 = vpop.f32.mrb[0].mxu0 }
 0x2e1   :  { %v359_v40 = vadd.f32 %v386_v38, %v358_v39  ;;  %v441_v41 = vpop.f32.mrb[1].mxu0 }
 0x2e3   :  { %362 = vst [vmem:[#allocation12] sm:$0xff] %v359_v40 }
 0x2e4   :  { %583 = shalt.err (!%p580_p11)
}
 0x2e5   :  { %s584_s27 = scalar_lea.hbm %s765_s8, 128 }
 0x2e6   :  { %p585_p12 = scmp.ne.s32.totalorder %s765_s8, %s584_s27  ;;  %p588_p13 = scmp.lt.u32.totalorder %s584_s27, %s765_s8 }
 0x2e8   :  { %p590_p0 = pnand %p588_p13, %p585_p12 }
 0x2ea   :  { %593 = shalt.err (!%p590_p0)
}
 0x2eb   :  { %372 = dma.vmem_to_hbm [thread:$0]  %s370_s24, 128, %s765_s8, [#allocation4]  }
 0x2ec   :  { %602 = dma.done.wait [#allocation4], 128  }
 0x2ed   :  { %603 = vsyncadd [#allocation4], 4294967168 }
 0x2ee   :  { %376 = vsyncpa [#allocation3], 1 }
 0x2ef   :  { %377 = vsyncpa [#allocation8], 1 }
 0x2f0   :  { %378 = vsyncpa [#allocation11], 1 }
 0x2f1   :  { %379 = vsyncpa [#allocation4], 1 }
 0x2f2   :  { %380 = vsyncpa [#allocation5], 1 }

</bundles_post_ra>
